<compile_context>
chip_gen: v7x
topology: tpu7x:2x2x1
jax: 0.10.0
libtpu: 0.0.40
codegen_flags: <defaults>
</compile_context>

<pallas_src>
import jax
import jax.numpy as jnp
from jax.experimental import pallas as pl
from jax.experimental.pallas import tpu as pltpu


def _round_up(n, m):
    return ((n + m - 1) // m) * m


def discriminator_kernel(cols_ref, mask_ref, wvec_ref, w1_ref, b1_ref, w2_ref,
                         b2_ref, w3_ref, bo_ref, out_ref):
    """One batch group: R = GB * blk slab rows (blk rows per batch element)."""
    R = cols_ref.shape[0]
    H = w1_ref.shape[1]
    GB = out_ref.shape[0]
    blk = R // GB
    cdt = cols_ref.dtype  # matmul compute dtype (bf16 by default)

    # ---- conv1 (k=5, pad=2): one MXU matmul on the wrapper-built im2col ----
    v1 = jnp.dot(cols_ref[...], w1_ref[...],
                 preferred_element_type=jnp.float32) + b1_ref[...]
    # LeakyReLU(0.2) fused with the batch-isolation mask: pad rows are zeroed
    # so neighbouring batch elements stay isolated for the next k=5 conv.
    h1 = mask_ref[...] * jnp.maximum(v1, 0.2 * v1)                 # (R, H) f32

    # ---- conv2 (k=5, pad=2): 5-tap MXU accumulation (no (R, 5H) im2col) ----
    zpad = jnp.zeros((2, H), jnp.float32)
    hp = jnp.concatenate([zpad, h1, zpad], axis=0)                 # (R+4, H)
    acc = jnp.zeros((R, H), jnp.float32)
    for k in range(5):                                # static unroll, 5 dots
        acc = acc + jnp.dot(hp[k:k + R, :].astype(cdt), w2_ref[k],
                            preferred_element_type=jnp.float32)
    v2 = acc + b2_ref[...]
    h2 = jnp.maximum(v2, 0.2 * v2)                                 # (R, H) f32

    # ---- head: conv1x1 + view(-1, L) + Linear(L, 1), reassociated ---------
    #   out[b] = (sum_l wl[l] * h2[row(b, l)]) @ w3 + (b3 * sum(wl) + bl)
    # wvec holds wl at valid rows and 0 at pad/alignment rows, so h2's garbage
    # pad rows never reach the output. Linear in B (no (B, P) scatter matrix).
    t = jnp.sum((h2 * wvec_ref[...]).reshape(GB, blk, H), axis=1)  # (GB, H)
    res = jnp.dot(t, w3_ref[...],
                  preferred_element_type=jnp.float32) + bo_ref[...]
    out_ref[...] = res.astype(out_ref.dtype)                       # (GB, 1)


def discriminator_forward(x, params, *, compute_dtype=jnp.bfloat16,
                          group_batch=8):
    """x: (B, seq_len, n_chars) float32 -> (B, 1) float32."""
    B, L, C = x.shape
    w1, b1, w2, b2, w3, b3, wl, bl = params
    H = w1.shape[0]
    K = 5

    blk = _round_up(L + 4, 8)            # rows per element (2 halo zeros/side)
    GB = group_batch if B > group_batch else B   # batch elements per grid step
    Bp = _round_up(B, GB)
    grid = (Bp // GB,)
    R = GB * blk                         # slab rows per grid step
    C5 = K * C

    # ---- wrapper-side packing (plain JAX glue) -----------------------------
    x32 = x.astype(jnp.float32)
    # Batch-folded slab: element b occupies rows [2, 2+L) of its blk-row block.
    xb = jnp.pad(x32, ((0, Bp - B), (2, blk - L - 2), (0, 0)))   # (Bp, blk, C)
    # conv1 im2col built here (C is small): tap k is the block shifted by k-2.
    xhp = jnp.pad(xb, ((0, 0), (2, 2), (0, 0)))                  # (Bp, blk+4, C)
    cols = jnp.concatenate([xhp[:, k:k + blk, :] for k in range(K)], axis=2)
    cols = cols.reshape(Bp * blk, C5).astype(compute_dtype)      # (Bp*blk, 5C)

    # Per-row validity mask / head row-weights in slab coordinates. Identical
    # for every batch element, so built once at (R, 1) and reused every step.
    valid = jnp.pad(jnp.ones((L,), jnp.float32), (2, blk - L - 2))     # (blk,)
    mask = jnp.tile(valid, GB).reshape(R, 1)
    wrow = jnp.pad(wl[0].astype(jnp.float32), (2, blk - L - 2))        # (blk,)
    wvec = jnp.tile(wrow, GB).reshape(R, 1)

    # Weights: im2col layout for conv1, per-tap (H_in, H_out) mats for conv2.
    w1f = jnp.transpose(w1, (2, 1, 0)).reshape(C5, H).astype(compute_dtype)
    w2t = jnp.transpose(w2, (2, 1, 0)).astype(compute_dtype)          # (5,H,H)
    b1r = b1.reshape(1, H).astype(jnp.float32)
    b2r = b2.reshape(1, H).astype(jnp.float32)
    w3c = w3[0, :, 0].reshape(H, 1).astype(jnp.float32)
    bo = (bl.reshape(1, 1) + b3.reshape(1, 1) * jnp.sum(wl)).astype(jnp.float32)

    itm = jnp.dtype(compute_dtype).itemsize
    flops = 2 * Bp * blk * H * (C5 + K * H) + 3 * Bp * blk * H + 2 * Bp * H
    bytes_accessed = (Bp * blk * C5 * itm + (C5 + K * H) * H * itm
                      + 2 * R * 4 + (2 * H + H + 1) * 4 + Bp * 4)
    # Per-step VMEM budget: double-buffered cols tile + f32 working set +
    # resident weights; clamp so it is valid on v7x (64 MiB physical).
    step_bytes = (2 * R * C5 * itm + 3 * R * H * 4 + (C5 + K * H) * H * itm)
    vmem_limit = int(min(max(4 * step_bytes, 32 * 1024 * 1024),
                         56 * 1024 * 1024))

    out = pl.pallas_call(
        discriminator_kernel,
        out_shape=jax.ShapeDtypeStruct((Bp, 1), jnp.float32),
        grid_spec=pltpu.PrefetchScalarGridSpec(
            num_scalar_prefetch=0,
            grid=grid,
            in_specs=[
                pl.BlockSpec((R, C5), lambda g: (g, 0)),       # activation tile
                pl.BlockSpec((R, 1), lambda g: (0, 0)),        # validity mask
                pl.BlockSpec((R, 1), lambda g: (0, 0)),        # head row weights
                pl.BlockSpec((C5, H), lambda g: (0, 0)),       # conv1 weights
                pl.BlockSpec((1, H), lambda g: (0, 0)),        # conv1 bias
                pl.BlockSpec((K, H, H), lambda g: (0, 0, 0)),  # conv2 tap mats
                pl.BlockSpec((1, H), lambda g: (0, 0)),        # conv2 bias
                pl.BlockSpec((H, 1), lambda g: (0, 0)),        # conv3/head weight
                pl.BlockSpec((1, 1), lambda g: (0, 0)),        # fused output bias
            ],
            out_specs=pl.BlockSpec((GB, 1), lambda g: (g, 0)),
        ),
        compiler_params=pltpu.CompilerParams(
            dimension_semantics=("parallel",),         # v7x dual-TC sharding
            vmem_limit_bytes=vmem_limit),
        cost_estimate=pl.CostEstimate(flops=int(flops), transcendentals=0,
                                      bytes_accessed=int(bytes_accessed)),
    )(cols, mask, wvec, w1f, b1r, w2t, b2r, w3c, bo)
    return out[:B]


def reference_forward(x, params):
    """Pure-JAX reference mirroring the PyTorch module (f32, HIGHEST precision)."""
    w1, b1, w2, b2, w3, b3, wl, bl = params
    B, L, _ = x.shape
    hi = jax.lax.Precision.HIGHEST

    def conv1d(h, w, b, pad):
        y = jax.lax.conv_general_dilated(
            h, w, window_strides=(1,), padding=[(pad, pad)],
            dimension_numbers=('NCH', 'OIH', 'NCH'), precision=hi)
        return y + b[None, :, None]

    def leaky(v):
        return jnp.maximum(v, 0.2 * v)

    h = jnp.transpose(x, (0, 2, 1))             # (B, C, L)
    h = leaky(conv1d(h, w1, b1, 2))
    h = leaky(conv1d(h, w2, b2, 2))
    h = conv1d(h, w3, b3, 0)                    # (B, 1, L)
    h = h.reshape(-1, L)                        # view(-1, seq_len)
    return jnp.dot(h, wl.T, precision=hi) + bl  # Linear(seq_len, 1)


if __name__ == "__main__":
    C, L, H = 4, 8, 32                          # n_chars, seq_len, hidden
    key = jax.random.PRNGKey(0)
    ks = jax.random.split(key, 10)

    def uinit(k, shape, fan_in):
        bound = 1.0 / (fan_in ** 0.5)
        return jax.random.uniform(k, shape, jnp.float32, -bound, bound)

    w1 = uinit(ks[1], (H, C, 5), C * 5); b1 = uinit(ks[2], (H,), C * 5)
    w2 = uinit(ks[3], (H, H, 5), H * 5); b2 = uinit(ks[4], (H,), H * 5)
    w3 = uinit(ks[5], (1, H, 1), H);     b3 = uinit(ks[6], (1,), H)
    wl = uinit(ks[7], (1, L), L);        bl = uinit(ks[8], (1,), L)
    params = (w1, b1, w2, b2, w3, b3, wl, bl)

    # Small case matching the module defaults (batch=2) -- single grid step.
    x2 = jax.random.normal(ks[0], (2, L, C), jnp.float32)
    ref2 = reference_forward(x2, params)
    out2_f32 = discriminator_forward(x2, params, compute_dtype=jnp.float32)
    jax.block_until_ready(out2_f32)
    assert out2_f32.shape == (2, 1), out2_f32.shape
    assert jnp.allclose(out2_f32, ref2, atol=2e-3, rtol=2e-3), (out2_f32, ref2)

    out2_bf16 = discriminator_forward(x2, params)   # default: bf16 MXU operands
    jax.block_until_ready(out2_bf16)
    assert jnp.allclose(out2_bf16, ref2, atol=3e-2, rtol=3e-2), (out2_bf16, ref2)

    # Larger batch to exercise the batch-group grid (2 steps of 8 elements).
    x16 = jax.random.normal(ks[9], (16, L, C), jnp.float32)
    ref16 = reference_forward(x16, params)
    out16 = discriminator_forward(x16, params)
    jax.block_until_ready(out16)
    assert out16.shape == (16, 1), out16.shape
    assert jnp.allclose(out16, ref16, atol=3e-2, rtol=3e-2), (out16, ref16)

    print("KERNEL_OK")
</pallas_src>

<mosaic_0001>
module attributes {stable_mosaic.version = 11 : i64} {
  func.func @discriminator_kernel(%arg0: i32, %arg1: memref<32x20xf32, #tpu.memory_space<vmem>>, %arg2: memref<32x1xf32, #tpu.memory_space<vmem>>, %arg3: memref<32x1xf32, #tpu.memory_space<vmem>>, %arg4: memref<20x32xf32, #tpu.memory_space<vmem>>, %arg5: memref<1x32xf32, #tpu.memory_space<vmem>>, %arg6: memref<5x32x32xf32, #tpu.memory_space<vmem>>, %arg7: memref<1x32xf32, #tpu.memory_space<vmem>>, %arg8: memref<32x1xf32, #tpu.memory_space<vmem>>, %arg9: memref<1x1xf32, #tpu.memory_space<vmem>>, %arg10: memref<2x1xf32, #tpu.memory_space<vmem>>) attributes {dimension_semantics = [#tpu.dimension_semantics<parallel>], iteration_bounds = array<i64: 1>, scalar_prefetch = 0 : i64, scratch_operands = 0 : i64, tpu.core_type = #tpu.core_type<tc>, window_params = [{transform_indices = @transform_0, window_bounds = array<i64: 32, 20>}, {pipeline_mode = #tpu.pipeline_mode<synchronous>, transform_indices = @transform_1, window_bounds = array<i64: 32, 1>}, {pipeline_mode = #tpu.pipeline_mode<synchronous>, transform_indices = @transform_2, window_bounds = array<i64: 32, 1>}, {pipeline_mode = #tpu.pipeline_mode<synchronous>, transform_indices = @transform_3, window_bounds = array<i64: 20, 32>}, {pipeline_mode = #tpu.pipeline_mode<synchronous>, transform_indices = @transform_4, window_bounds = array<i64: 1, 32>}, {pipeline_mode = #tpu.pipeline_mode<synchronous>, transform_indices = @transform_5, window_bounds = array<i64: 5, 32, 32>}, {pipeline_mode = #tpu.pipeline_mode<synchronous>, transform_indices = @transform_6, window_bounds = array<i64: 1, 32>}, {pipeline_mode = #tpu.pipeline_mode<synchronous>, transform_indices = @transform_7, window_bounds = array<i64: 32, 1>}, {pipeline_mode = #tpu.pipeline_mode<synchronous>, transform_indices = @transform_8, window_bounds = array<i64: 1, 1>}, {transform_indices = @transform_9, window_bounds = array<i64: 2, 1>}]} {
    %c0 = arith.constant 0 : index
    %c0_0 = arith.constant 0 : index
    %0 = vector.load %arg1[%c0, %c0_0] : memref<32x20xf32, #tpu.memory_space<vmem>>, vector<32x20xf32>
    %c0_1 = arith.constant 0 : index
    %c0_2 = arith.constant 0 : index
    %1 = vector.load %arg4[%c0_1, %c0_2] : memref<20x32xf32, #tpu.memory_space<vmem>>, vector<20x32xf32>
    %cst = arith.constant dense<0.000000e+00> : vector<32x32xf32>
    %2 = tpu.matmul %0, %1, %cst {dimension_numbers = #tpu.dot_dimension_numbers<[1], [0], [0], [1], [0, 0, 1, 1], [], []>} : vector<32x20xf32>, vector<20x32xf32>, vector<32x32xf32> -> vector<32x32xf32>
    %c0_3 = arith.constant 0 : index
    %c0_4 = arith.constant 0 : index
    %3 = vector.load %arg5[%c0_3, %c0_4] : memref<1x32xf32, #tpu.memory_space<vmem>>, vector<1x32xf32>
    %4 = vector.broadcast %3 : vector<1x32xf32> to vector<32x32xf32>
    %5 = arith.addf %2, %4 : vector<32x32xf32>
    %c0_5 = arith.constant 0 : index
    %c0_6 = arith.constant 0 : index
    %6 = vector.load %arg2[%c0_5, %c0_6] : memref<32x1xf32, #tpu.memory_space<vmem>>, vector<32x1xf32>
    %cst_7 = arith.constant 2.000000e-01 : f32
    %7 = vector.broadcast %cst_7 : f32 to vector<32x32xf32>
    %8 = arith.mulf %7, %5 : vector<32x32xf32>
    %9 = arith.maximumf %5, %8 : vector<32x32xf32>
    %10 = vector.broadcast %6 : vector<32x1xf32> to vector<32x32xf32>
    %11 = arith.mulf %10, %9 : vector<32x32xf32>
    %cst_8 = arith.constant 0.000000e+00 : f32
    %12 = vector.broadcast %cst_8 : f32 to vector<2x32xf32>
    %13 = tpu.concatenate %12, %11, %12 in 0 : vector<2x32xf32>, vector<32x32xf32>, vector<2x32xf32> -> vector<36x32xf32>
    %cst_9 = arith.constant 0.000000e+00 : f32
    %14 = vector.broadcast %cst_9 : f32 to vector<32x32xf32>
    %15 = vector.extract_strided_slice %13 {offsets = [0, 0], sizes = [32, 32], strides = [1, 1]} : vector<36x32xf32> to vector<32x32xf32>
    %c0_10 = arith.constant 0 : index
    %c0_11 = arith.constant 0 : index
    %c0_12 = arith.constant 0 : index
    %16 = vector.load %arg6[%c0_10, %c0_11, %c0_12] : memref<5x32x32xf32, #tpu.memory_space<vmem>>, vector<1x32x32xf32>
    %17 = vector.shape_cast %16 : vector<1x32x32xf32> to vector<32x32xf32>
    %cst_13 = arith.constant dense<0.000000e+00> : vector<32x32xf32>
    %18 = tpu.matmul %15, %17, %cst_13 {dimension_numbers = #tpu.dot_dimension_numbers<[1], [0], [0], [1], [0, 0, 1, 1], [], []>} : vector<32x32xf32>, vector<32x32xf32>, vector<32x32xf32> -> vector<32x32xf32>
    %19 = arith.addf %14, %18 : vector<32x32xf32>
    %20 = vector.extract_strided_slice %13 {offsets = [1, 0], sizes = [32, 32], strides = [1, 1]} : vector<36x32xf32> to vector<32x32xf32>
    %c1 = arith.constant 1 : index
    %c0_14 = arith.constant 0 : index
    %c0_15 = arith.constant 0 : index
    %21 = vector.load %arg6[%c1, %c0_14, %c0_15] : memref<5x32x32xf32, #tpu.memory_space<vmem>>, vector<1x32x32xf32>
    %22 = vector.shape_cast %21 : vector<1x32x32xf32> to vector<32x32xf32>
    %cst_16 = arith.constant dense<0.000000e+00> : vector<32x32xf32>
    %23 = tpu.matmul %20, %22, %cst_16 {dimension_numbers = #tpu.dot_dimension_numbers<[1], [0], [0], [1], [0, 0, 1, 1], [], []>} : vector<32x32xf32>, vector<32x32xf32>, vector<32x32xf32> -> vector<32x32xf32>
    %24 = arith.addf %19, %23 : vector<32x32xf32>
    %25 = vector.extract_strided_slice %13 {offsets = [2, 0], sizes = [32, 32], strides = [1, 1]} : vector<36x32xf32> to vector<32x32xf32>
    %c2 = arith.constant 2 : index
    %c0_17 = arith.constant 0 : index
    %c0_18 = arith.constant 0 : index
    %26 = vector.load %arg6[%c2, %c0_17, %c0_18] : memref<5x32x32xf32, #tpu.memory_space<vmem>>, vector<1x32x32xf32>
    %27 = vector.shape_cast %26 : vector<1x32x32xf32> to vector<32x32xf32>
    %cst_19 = arith.constant dense<0.000000e+00> : vector<32x32xf32>
    %28 = tpu.matmul %25, %27, %cst_19 {dimension_numbers = #tpu.dot_dimension_numbers<[1], [0], [0], [1], [0, 0, 1, 1], [], []>} : vector<32x32xf32>, vector<32x32xf32>, vector<32x32xf32> -> vector<32x32xf32>
    %29 = arith.addf %24, %28 : vector<32x32xf32>
    %30 = vector.extract_strided_slice %13 {offsets = [3, 0], sizes = [32, 32], strides = [1, 1]} : vector<36x32xf32> to vector<32x32xf32>
    %c3 = arith.constant 3 : index
    %c0_20 = arith.constant 0 : index
    %c0_21 = arith.constant 0 : index
    %31 = vector.load %arg6[%c3, %c0_20, %c0_21] : memref<5x32x32xf32, #tpu.memory_space<vmem>>, vector<1x32x32xf32>
    %32 = vector.shape_cast %31 : vector<1x32x32xf32> to vector<32x32xf32>
    %cst_22 = arith.constant dense<0.000000e+00> : vector<32x32xf32>
    %33 = tpu.matmul %30, %32, %cst_22 {dimension_numbers = #tpu.dot_dimension_numbers<[1], [0], [0], [1], [0, 0, 1, 1], [], []>} : vector<32x32xf32>, vector<32x32xf32>, vector<32x32xf32> -> vector<32x32xf32>
    %34 = arith.addf %29, %33 : vector<32x32xf32>
    %35 = vector.extract_strided_slice %13 {offsets = [4, 0], sizes = [32, 32], strides = [1, 1]} : vector<36x32xf32> to vector<32x32xf32>
    %c4 = arith.constant 4 : index
    %c0_23 = arith.constant 0 : index
    %c0_24 = arith.constant 0 : index
    %36 = vector.load %arg6[%c4, %c0_23, %c0_24] : memref<5x32x32xf32, #tpu.memory_space<vmem>>, vector<1x32x32xf32>
    %37 = vector.shape_cast %36 : vector<1x32x32xf32> to vector<32x32xf32>
    %cst_25 = arith.constant dense<0.000000e+00> : vector<32x32xf32>
    %38 = tpu.matmul %35, %37, %cst_25 {dimension_numbers = #tpu.dot_dimension_numbers<[1], [0], [0], [1], [0, 0, 1, 1], [], []>} : vector<32x32xf32>, vector<32x32xf32>, vector<32x32xf32> -> vector<32x32xf32>
    %39 = arith.addf %34, %38 : vector<32x32xf32>
    %c0_26 = arith.constant 0 : index
    %c0_27 = arith.constant 0 : index
    %40 = vector.load %arg7[%c0_26, %c0_27] : memref<1x32xf32, #tpu.memory_space<vmem>>, vector<1x32xf32>
    %41 = vector.broadcast %40 : vector<1x32xf32> to vector<32x32xf32>
    %42 = arith.addf %39, %41 : vector<32x32xf32>
    %cst_28 = arith.constant 2.000000e-01 : f32
    %43 = vector.broadcast %cst_28 : f32 to vector<32x32xf32>
    %44 = arith.mulf %43, %42 : vector<32x32xf32>
    %45 = arith.maximumf %42, %44 : vector<32x32xf32>
    %c0_29 = arith.constant 0 : index
    %c0_30 = arith.constant 0 : index
    %46 = vector.load %arg3[%c0_29, %c0_30] : memref<32x1xf32, #tpu.memory_space<vmem>>, vector<32x1xf32>
    %47 = vector.broadcast %46 : vector<32x1xf32> to vector<32x32xf32>
    %48 = arith.mulf %45, %47 : vector<32x32xf32>
    %49 = vector.shape_cast %48 : vector<32x32xf32> to vector<2x16x32xf32>
    %cst_31 = arith.constant dense<0.000000e+00> : vector<2x32xf32>
    %50 = vector.multi_reduction <add>, %49, %cst_31 [1] : vector<2x16x32xf32> to vector<2x32xf32>
    %c0_32 = arith.constant 0 : index
    %c0_33 = arith.constant 0 : index
    %51 = vector.load %arg8[%c0_32, %c0_33] : memref<32x1xf32, #tpu.memory_space<vmem>>, vector<32x1xf32>
    %cst_34 = arith.constant dense<0.000000e+00> : vector<2x1xf32>
    %52 = tpu.matmul %50, %51, %cst_34 {dimension_numbers = #tpu.dot_dimension_numbers<[1], [0], [0], [1], [0, 0, 1, 1], [], []>} : vector<2x32xf32>, vector<32x1xf32>, vector<2x1xf32> -> vector<2x1xf32>
    %c0_35 = arith.constant 0 : index
    %c0_36 = arith.constant 0 : index
    %53 = vector.load %arg9[%c0_35, %c0_36] : memref<1x1xf32, #tpu.memory_space<vmem>>, vector<1x1xf32>
    %54 = vector.broadcast %53 : vector<1x1xf32> to vector<2x1xf32>
    %55 = arith.addf %52, %54 : vector<2x1xf32>
    %c0_37 = arith.constant 0 : index
    %c0_38 = arith.constant 0 : index
    %56 = vector.load %arg10[%c0_37, %c0_38] : memref<2x1xf32, #tpu.memory_space<vmem>>, vector<2x1xf32>
    tpu.vector_store %arg10[%c0_37, %c0_38], %55 {strides = array<i32>} : memref<2x1xf32, #tpu.memory_space<vmem>>, vector<2x1xf32>,
    return
  }
  func.func @transform_0(%arg0: i32) -> (i32, i32) {
    %c0_i32 = arith.constant 0 : i32
    %c0_i32_0 = arith.constant 0 : i32
    return %arg0, %c0_i32 : i32, i32
  }
  func.func @transform_1(%arg0: i32) -> (i32, i32) {
    %c0_i32 = arith.constant 0 : i32
    %c0_i32_0 = arith.constant 0 : i32
    %c0_i32_1 = arith.constant 0 : i32
    return %c0_i32, %c0_i32_0 : i32, i32
  }
  func.func @transform_2(%arg0: i32) -> (i32, i32) {
    %c0_i32 = arith.constant 0 : i32
    %c0_i32_0 = arith.constant 0 : i32
    %c0_i32_1 = arith.constant 0 : i32
    return %c0_i32, %c0_i32_0 : i32, i32
  }
  func.func @transform_3(%arg0: i32) -> (i32, i32) {
    %c0_i32 = arith.constant 0 : i32
    %c0_i32_0 = arith.constant 0 : i32
    %c0_i32_1 = arith.constant 0 : i32
    return %c0_i32, %c0_i32_0 : i32, i32
  }
  func.func @transform_4(%arg0: i32) -> (i32, i32) {
    %c0_i32 = arith.constant 0 : i32
    %c0_i32_0 = arith.constant 0 : i32
    %c0_i32_1 = arith.constant 0 : i32
    return %c0_i32, %c0_i32_0 : i32, i32
  }
  func.func @transform_5(%arg0: i32) -> (i32, i32, i32) {
    %c0_i32 = arith.constant 0 : i32
    %c0_i32_0 = arith.constant 0 : i32
    %c0_i32_1 = arith.constant 0 : i32
    %c0_i32_2 = arith.constant 0 : i32
    return %c0_i32, %c0_i32_0, %c0_i32_1 : i32, i32, i32
  }
  func.func @transform_6(%arg0: i32) -> (i32, i32) {
    %c0_i32 = arith.constant 0 : i32
    %c0_i32_0 = arith.constant 0 : i32
    %c0_i32_1 = arith.constant 0 : i32
    return %c0_i32, %c0_i32_0 : i32, i32
  }
  func.func @transform_7(%arg0: i32) -> (i32, i32) {
    %c0_i32 = arith.constant 0 : i32
    %c0_i32_0 = arith.constant 0 : i32
    %c0_i32_1 = arith.constant 0 : i32
    return %c0_i32, %c0_i32_0 : i32, i32
  }
  func.func @transform_8(%arg0: i32) -> (i32, i32) {
    %c0_i32 = arith.constant 0 : i32
    %c0_i32_0 = arith.constant 0 : i32
    %c0_i32_1 = arith.constant 0 : i32
    return %c0_i32, %c0_i32_0 : i32, i32
  }
  func.func @transform_9(%arg0: i32) -> (i32, i32) {
    %c0_i32 = arith.constant 0 : i32
    %c0_i32_0 = arith.constant 0 : i32
    return %arg0, %c0_i32 : i32, i32
  }
}

</mosaic_0001>

<bundles_post_ra>
// kernel: tpu_custom_call.1
= control target key start
LH: loop header
LB: loop body
LE: loop exit
PB: predicated region body
PF: predicated region fallthrough
CT: control target
= control target key end

     0   :  { %s1467_s0 = inlined_call_operand.vmem [shape: f32[32,20], index: 0, kind: input, shape index: {}]   ;;  %s1468_s1 = inlined_call_operand.vmem [shape: f32[32,1], index: 1, kind: input, shape index: {}]   ;;  %s1469_s2 = inlined_call_operand.vmem [shape: f32[32,1], index: 2, kind: input, shape index: {}]   ;;  %s1470_s3 = inlined_call_operand.hbm [shape: f32[20,32], index: 3, kind: input, shape index: {}]   ;;  %s1471_s4 = inlined_call_operand.vmem [shape: f32[1,32], index: 4, kind: input, shape index: {}]   ;;  %s1472_s5 = inlined_call_operand.vmem [shape: f32[5,32,32], index: 5, kind: input, shape index: {}]   ;;  %s1473_s6 = inlined_call_operand.vmem [shape: f32[1,32], index: 6, kind: input, shape index: {}]   ;;  %s1474_s7 = inlined_call_operand.vmem [shape: f32[32,1], index: 7, kind: input, shape index: {}]   ;;  %s1475_s8 = inlined_call_operand.<no memory space> [shape: f32[1,1], index: 8, kind: input, shape index: {}]   ;;  %s1476_s9 = inlined_call_operand.vmem [shape: f32[2,1], index: 9, kind: output, shape index: {}]  }
   0x1   :  { %v14_v0 = vstv %s1475_s8 }
   0x2   :  { %15 = vst [vmem:[#allocation2] sm:$0x1] %v14_v0 }
   0x3   :  { %16 = vsyncpa [#allocation4], 0  ;;  %s1207_s11 = smov [#allocation3]   ;;  %s1183_s15 = scalar_lea.hbm %s1470_s3, 384 }
   0x4   :  { %s28_s12 = sshll.u32 %s1207_s11, 4  ;;  %p1184_p0 = scmp.ne.s32.totalorder %s1470_s3, %s1183_s15  ;;  %s29_s12 = int_to_ptr.vmem [resolvable:$true] %s28_s12 }
   0x5   :  { %p1187_p1 = scmp.lt.u32.totalorder %s1183_s15, %s1470_s3 }
   0x7   :  { %p1189_p2 = pnand %p1187_p1, %p1184_p0 }
   0x9   :  { %1192 = shalt.err (!%p1189_p2)
}
   0xa   :  { %s1193_s8 = scalar_lea.vmem %s29_s12, 384  ;;  %p1198_p4 = scmp.lt.s32.totalorder %s29_s12, %s29_s12 }
   0xb   :  { %p1194_p3 = scmp.ne.s32.totalorder %s29_s12, %s1193_s8  ;;  %p1199_p5 = scmp.lt.s32.totalorder %s1193_s8, %s1193_s8 }
   0xd   :  { %p1200_p6 = por %p1199_p5, %p1198_p4 }
   0xf   :  { %p1201_p7 = pnand %p1200_p6, %p1194_p3 }
  0x11   :  { %1204 = shalt.err (!%p1201_p7)
}
  0x12   :  { %s1208_s20 = smov 128   ;;  %s1209_s21 = smov 8  }
  0x13   :  { %34 = dma.hbm_to_vmem [thread:$0]  %s1470_s3, 384, %s29_s12, [#allocation4], %s1208_s20, %s1208_s20, %s1209_s21  }
  0x14   :  { %1205 = dma.done.wait [#allocation4], 384  }
  0x15   :  { %1206 = vsyncadd [#allocation4], 4294966912  ;;  %v1210_v1 = vmov 0   ;;  %vm62_vm0 = vcmask 162816   ;;  %v52_v2 = vld [vmem:[#allocation3] sm:$0xff]  ;;  %v53_v3 = vld [vmem:[#allocation3 + $0x8] sm:$0xff] }
  0x16   :  { %1181 = vset.pattern.permute.xlu0 %v1210_v1  ;;  %1182 = vset.pattern.permute.xlu1 %v1210_v1  ;;  %v1108_v4 = vpack.c.bf16 %v53_v3, %v52_v2  ;;  %v48_v5 = vld [vmem:[%s1467_s0] sm:$0xff]  ;;  %v54_v6 = vld [vmem:[#allocation3 + $0x10] sm:$0xf]  ;;  %vm75_vm1 = vcmask 1043456   ;;  %v165_v9 = vld [vmem:[%s1468_s1 + $0x8] sm:$0xff]  ;;  %vm204_vm2 = vcmask 1041408  }
  0x17   :  { %1021 = vmatprep.mubr.msk.f32.mxu0 %vm62_vm0, %v48_v5  ;;  %v164_v7 = vld [vmem:[%s1468_s1] sm:$0xff]  ;;  %v166_v8 = vld [vmem:[%s1468_s1 + $0x10] sm:$0xff]  ;;  %v167_v10 = vld [vmem:[%s1468_s1 + $0x18] sm:$0xff]  ;;  %vm227_vm3 = vcmask 1046528   ;;  %vm429_vm4 = vcmask 1045504   ;;  %vm237_vm5 = vcmask 261120  }
  0x18   :  { %1109 = vmatprep.subr.bf16.mxu0 %v1108_v4  ;;  %178 = vperm.xlu0 %1181, %v164_v7   ;;  %v49_v11 = vld [vmem:[%s1467_s0 + $0x8] sm:$0xff]  ;;  %v50_v12 = vld [vmem:[%s1467_s0 + $0x10] sm:$0xff]  ;;  %v778_v13 = vld [vmem:[%s1469_s2] sm:$0xff]  ;;  %vm541_vm6 = vcmask 1044480   ;;  %vm1212_vm7 = vmmov 0   ;;  %vm837_vm8 = vcmask 1041409  }
  0x19   :  { %1111 = vmatpush3.bf16.msra.mxu0 %v1108_v4  ;;  %188 = vperm.xlu1 %1182, %v166_v8   ;;  %v779_v14 = vld [vmem:[%s1469_s2 + $0x8] sm:$0xff]  ;;  %v51_v15 = vld [vmem:[%s1467_s0 + $0x18] sm:$0xff]  ;;  %v780_v16 = vld [vmem:[%s1469_s2 + $0x10] sm:$0xff]  ;;  %vm911_vm9 = vcmask 1024  }
  0x1a   :  { %1019 = vmatprep.subr.msk.mxu0 %vm75_vm1, %v54_v6  ;;  %v781_v17 = vld [vmem:[%s1469_s2 + $0x18] sm:$0xff]  ;;  %v936_v18 = vld [vmem:[%s1472_s5 + $0x40] sm:$0xff]  ;;  %v937_v19 = vld [vmem:[%s1472_s5 + $0x48] sm:$0xff] }
  0x1b   :  { %v924_v20 = vld [vmem:[%s1472_s5 + $0x20] sm:$0xff]  ;;  %v1128_v21 = vpack.c.bf16 %v937_v19, %v936_v18  ;;  %v925_v22 = vld [vmem:[%s1472_s5 + $0x28] sm:$0xff]  ;;  %v938_v24 = vld [vmem:[%s1472_s5 + $0x50] sm:$0xff] }
  0x1c   :  { %183 = vperm.xlu0 %1181, %v165_v9   ;;  %v1112_v23 = vpack.c.bf16 %v925_v22, %v924_v20  ;;  %v939_v25 = vld [vmem:[%s1472_s5 + $0x58] sm:$0xff]  ;;  %v926_v26 = vld [vmem:[%s1472_s5 + $0x30] sm:$0xff]  ;;  %v944_v30 = vld [vmem:[%s1472_s5 + $0x60] sm:$0xff] }
  0x1d   :  { %1020 = vmatpush3.msk.msra.mxu0 %vm75_vm1, %v54_v6  ;;  %193 = vperm.xlu1 %1182, %v167_v10   ;;  %v1132_v27 = vpack.c.bf16 %v939_v25, %v938_v24  ;;  %v927_v28 = vld [vmem:[%s1472_s5 + $0x38] sm:$0xff]  ;;  %v945_v31 = vld [vmem:[%s1472_s5 + $0x68] sm:$0xff]  ;;  %v216_v33 = vld [vmem:[%s1472_s5] sm:$0xff] }
  0x1e   :  { %1022 = vmatmul.mubr.msk.f32.vlgmr.msra.gmra.mrb[0].mxu0 %vm62_vm0, %v49_v11  ;;  %1129 = vmatprep.subr.bf16.mxu1 %v1128_v21  ;;  %v1116_v29 = vpack.c.bf16 %v927_v28, %v926_v26  ;;  %v1351_v32 = vpack.c.bf16 %v945_v31, %v944_v30  ;;  %v217_v34 = vld [vmem:[%s1472_s5 + $0x8] sm:$0xff]  ;;  %v918_v36 = vld [vmem:[%s1471_s4] ss:$0 sm:$0xff]  ;;  %v946_v56 = vld [vmem:[%s1472_s5 + $0x70] sm:$0xff] }
  0x1f   :  { %1024 = vmatprep.mubr.msk.f32.mxu0 %vm62_vm0, %v50_v12  ;;  %1113 = vmatprep.subr.bf16.mxu0 %v1112_v23  ;;  %v1359_v35 = vpack.c.bf16 %v217_v34, %v216_v33  ;;  %v947_v57 = vld [vmem:[%s1472_s5 + $0x78] sm:$0xff]  ;;  %v218_v60 = vld [vmem:[%s1472_s5 + $0x10] sm:$0xff] }
  0x20   :  { %784 = vperm.xlu0 %1181, %v778_v13   ;;  %1131 = vmatpush3.bf16.msra.mxu1 %v1128_v21  ;;  %v219_v61 = vld [vmem:[%s1472_s5 + $0x18] sm:$0xff]  ;;  %v1378_v2 = vpack.c.bf16 %v947_v57, %v946_v56  ;;  %v826_v56 = vld [vmem:[%s1474_s7 + $0x10] sm:$0xff]  ;;  %v1211_v57 = vmov 0.0|0.0  }
  0x21   :  { %789 = vperm.xlu1 %1182, %v779_v14   ;;  %1115 = vmatpush3.bf16.msra.mxu0 %v1112_v23  ;;  %v1124_v6 = vpack.c.bf16 %v219_v61, %v218_v60  ;;  %v1213_v60 = vmov 0.0  }
  0x22   :  { %1025 = vmatmul.mubr.msk.f32.gmra.mrb[2].mxu0 %vm62_vm0, %v51_v15  ;;  %1133 = vmatprep.subr.bf16.mxu1 %v1132_v27 }
  0x23   :  { %1117 = vmatprep.subr.bf16.mxu0 %v1116_v29 }
  0x24   :  { %794 = vperm.xlu0 %1181, %v780_v16   ;;  %1135 = vmatpush3.bf16.msra.mxu1 %v1132_v27 }
  0x25   :  { %799 = vperm.xlu1 %1182, %v781_v17   ;;  %1119 = vmatpush3.bf16.msra.mxu0 %v1116_v29 }
  0x26   :  { %1137 = vmatprep.subr.bf16.mxu1 %v1351_v32  ;;  %1121 = vmatprep.subr.bf16.mxu0 %v1359_v35 }
  0x97   :  { %v179_v37 = vpop.permute.xlu0 %178 }
  0x98   :  { %v189_v43 = vpop.permute.xlu1 %188 }
  0x9b   :  { %v184_v49 = vpop.permute.xlu0 %183 }
  0x9c   :  { %v194_v63 = vpop.permute.xlu1 %193 }
  0xf1   :  { %v1023_v38 = vpop.f32.mrb[0].mxu0 }
  0xf2   :  { %v151_v39 = vadd.f32 %v1023_v38, %v918_v36  ;;  %v145_v40 = vpop.f32.mrb[1].mxu0 }
  0xf3   :  { %v146_v41 = vadd.f32 %v918_v36, %v145_v40  ;;  %v953_v40 = vld [vmem:[%s1472_s5 + $0x88] sm:$0xff] }
  0xf4   :  { %v169_v42 = vmul.f32 0.2, %v151_v39 }
  0xf5   :  { %v168_v44 = vmul.f32 0.2, %v146_v41  ;;  %v1026_v45 = vpop.f32.mrb[2].mxu0 }
  0xf6   :  { %v173_v46 = vmax.f32 %v151_v39, %v169_v42  ;;  %v161_v47 = vadd.f32 %v1026_v45, %v918_v36  ;;  %v155_v48 = vpop.f32.mrb[3].mxu0  ;;  %v952_v39 = vld [vmem:[%s1472_s5 + $0x80] sm:$0xff] }
  0xf7   :  { %v172_v50 = vmax.f32 %v146_v41, %v168_v44  ;;  %v156_v51 = vadd.f32 %v918_v36, %v155_v48 }
  0xf8   :  { %v197_v52 = vmul.f32 %v184_v49, %v173_v46  ;;  %v171_v53 = vmul.f32 0.2, %v161_v47  ;;  %v1144_v49 = vpack.c.bf16 %v953_v40, %v952_v39 }
  0xf9   :  { %v196_v54 = vmul.f32 %v179_v37, %v172_v50  ;;  %v170_v55 = vmul.f32 0.2, %v156_v51 }
  0xfa   :  { %v206_v58 = vrot.slane %v197_v52, 6  ;;  %v175_v59 = vmax.f32 %v161_v47, %v171_v53 }
  0xfb   :  { %v205_v62 = vrot.slane %v196_v54, 6  ;;  %v174_v0 = vmax.f32 %v156_v51, %v170_v55  ;;  %v955_v51 = vld [vmem:[%s1472_s5 + $0x98] sm:$0xff]  ;;  %v824_v54 = vld [vmem:[%s1474_s7] sm:$0xff]  ;;  %v825_v55 = vld [vmem:[%s1474_s7 + $0x8] sm:$0xff] }
  0xfc   :  { %v199_v1 = vmul.f32 %v194_v63, %v175_v59  ;;  %v827_v59 = vld [vmem:[%s1474_s7 + $0x18] sm:$0xff] }
  0xfd   :  { %v1381_v3 = vsel %vm204_vm2, %v205_v62, %v206_v58  ;;  %v214_v4 = vsel %vm204_vm2, 0.0, %v205_v62  ;;  %v198_v5 = vmul.f32 %v189_v43, %v174_v0  ;;  %v1156_v61 = vpack.c.bf16 %v827_v59, %v826_v56 }
  0xfe   :  { %v210_v7 = vrot.slane %v199_v1, 6  ;;  %v228_v8 = vrot.slane %v214_v4, 1  ;;  %v229_v9 = vrot.slane %v1381_v3, 1  ;;  %v430_v10 = vrot.slane %v214_v4, 2 }
  0xff   :  { %v208_v11 = vrot.slane %v198_v5, 6  ;;  %v431_v12 = vrot.slane %v1381_v3, 2  ;;  %v542_v13 = vrot.slane %v214_v4, 3  ;;  %v543_v14 = vrot.slane %v1381_v3, 3 }
 0x100   :  { %v215_v15 = vsel %vm204_vm2, %v210_v7, 0.0  ;;  %v230_v16 = vsel %vm227_vm3, %v228_v8, %v229_v9  ;;  %v653_v17 = vrot.slane %v214_v4, 4  ;;  %v654_v18 = vrot.slane %v1381_v3, 4 }
 0x101   :  { %v209_v19 = vsel %vm204_vm2, %v206_v58, %v208_v11  ;;  %v211_v20 = vsel %vm204_vm2, %v208_v11, %v210_v7  ;;  %1035 = vmatprep.mubr.msk.f32.mxu0 %vm237_vm5, %v230_v16  ;;  %v432_v21 = vsel %vm429_vm4, %v430_v10, %v431_v12  ;;  %v235_v22 = vrot.slane %v215_v15, 1  ;;  %v785_v16 = vpop.permute.xlu0 %784 }
 0x102   :  { %1063 = vmatprep.mubr.msk.f32.mxu1 %vm237_vm5, %v432_v21  ;;  %v231_v23 = vrot.slane %v209_v19, 1  ;;  %v433_v24 = vrot.slane %v209_v19, 2  ;;  %v233_v25 = vrot.slane %v211_v20, 1  ;;  %v435_v26 = vrot.slane %v211_v20, 2 }
 0x103   :  { %v437_v27 = vrot.slane %v215_v15, 2  ;;  %v544_v28 = vsel %vm541_vm6, %v542_v13, %v543_v14  ;;  %v545_v29 = vrot.slane %v209_v19, 3  ;;  %v547_v30 = vrot.slane %v211_v20, 3  ;;  %v790_v13 = vpop.permute.xlu1 %789 }
 0x104   :  { %v232_v31 = vsel %vm227_vm3, %v229_v9, %v231_v23  ;;  %v434_v33 = vsel %vm429_vm4, %v431_v12, %v433_v24  ;;  %v234_v34 = vsel %vm227_vm3, %v231_v23, %v233_v25  ;;  %v436_v36 = vsel %vm429_vm4, %v433_v24, %v435_v26 }
 0x105   :  { %1036 = vmatmul.mubr.msk.f32.vlgmr.msra.gmra.mrb[4].mxu0 %vm237_vm5, %v232_v31  ;;  %1064 = vmatmul.mubr.msk.f32.vlgmr.msra.gmra.mrb[0].mxu1 %vm237_vm5, %v434_v33  ;;  %v236_v37 = vsel %vm227_vm3, %v233_v25, %v235_v22  ;;  %v438_v38 = vsel %vm429_vm4, %v435_v26, %v437_v27  ;;  %v546_v41 = vsel %vm541_vm6, %v543_v14, %v545_v29  ;;  %v549_v42 = vrot.slane %v215_v15, 3 }
 0x106   :  { %1139 = vmatpush3.bf16.msra.mxu1 %v1351_v32  ;;  %1038 = vmatprep.mubr.msk.f32.mxu0 %vm237_vm5, %v234_v34  ;;  %v548_v43 = vsel %vm541_vm6, %v545_v29, %v547_v30  ;;  %v655_v44 = vsel %vm75_vm1, %v653_v17, %v654_v18  ;;  %v656_v45 = vrot.slane %v209_v19, 4  ;;  %v658_v46 = vrot.slane %v211_v20, 4 }
 0x107   :  { %1123 = vmatpush3.bf16.msra.mxu0 %v1359_v35  ;;  %1066 = vmatprep.mubr.msk.f32.mxu1 %vm237_vm5, %v436_v36  ;;  %v550_v47 = vsel %vm541_vm6, %v547_v30, %v549_v42  ;;  %v660_v48 = vrot.slane %v215_v15, 4  ;;  %v954_v35 = vld [vmem:[%s1472_s5 + $0x90] sm:$0xff]  ;;  %v1153_v58 = vpack.c.bf16 %v825_v55, %v824_v54  ;;  %v800_v27 = vpop.permute.xlu1 %799  ;;  %v795_v30 = vpop.permute.xlu0 %794 }
 0x108   :  { %1141 = vmatprep.subr.bf16.mxu1 %v1378_v2  ;;  %1125 = vmatprep.subr.bf16.mxu0 %v1124_v6  ;;  %v657_v32 = vsel %vm75_vm1, %v654_v18, %v656_v45  ;;  %v659_v50 = vsel %vm75_vm1, %v656_v45, %v658_v46  ;;  %v1148_v53 = vpack.c.bf16 %v955_v51, %v954_v35  ;;  %v961_v35 = vld [vmem:[#allocation2] ss:$0 sm:$0xff] }
 0x109   :  { %1039 = vmatmul.mubr.msk.f32.gmra.mrb[6].mxu0 %vm237_vm5, %v236_v37  ;;  %1067 = vmatmul.mubr.msk.f32.gmra.mrb[2].mxu1 %vm237_vm5, %v438_v38  ;;  %v661_v52 = vsel %vm75_vm1, %v658_v46, %v660_v48 }
 0x10a   :  { %1143 = vmatpush3.bf16.msra.mxu1 %v1378_v2  ;;  %1049 = vmatprep.mubr.msk.f32.mxu0 %vm237_vm5, %v214_v4 }
 0x10b   :  { %1127 = vmatpush3.bf16.msra.mxu0 %v1124_v6  ;;  %1077 = vmatprep.mubr.msk.f32.mxu1 %vm237_vm5, %v544_v28 }
 0x10c   :  { %1145 = vmatprep.subr.bf16.mxu1 %v1144_v49  ;;  %1152 = vmatprep.subr.bf16.mxu0 %v1211_v57 }
 0x10d   :  { %1078 = vmatmul.mubr.msk.f32.vlgmr.msra.gmra.mrb[0].mxu1 %vm237_vm5, %v546_v41 }
 0x10e   :  { %1050 = vmatmul.mubr.msk.f32.vlgmr.msra.gmra.mrb[4].mxu0 %vm237_vm5, %v1381_v3  ;;  %1147 = vmatpush3.bf16.msra.mxu1 %v1144_v49  ;;  %v960_v3 = vld [vmem:[%s1473_s6] ss:$0 sm:$0xff] }
 0x10f   :  { %1052 = vmatprep.mubr.msk.f32.mxu0 %vm237_vm5, %v209_v19  ;;  %1080 = vmatprep.mubr.msk.f32.mxu1 %vm237_vm5, %v548_v43 }
 0x110   :  { %1149 = vmatprep.subr.bf16.mxu1 %v1148_v53  ;;  %1154 = vmatpush3.bf16.msra.mxu0 %v1153_v58 }
 0x111   :  { %1081 = vmatmul.mubr.msk.f32.gmra.mrb[2].mxu1 %vm237_vm5, %v550_v47  ;;  %1155 = vmatprep.subr.bf16.mxu0 %v1211_v57 }
 0x112   :  { %1053 = vmatmul.mubr.msk.f32.gmra.mrb[6].mxu0 %vm237_vm5, %v211_v20  ;;  %1151 = vmatpush3.bf16.msra.mxu1 %v1148_v53 }
 0x113   :  { %1091 = vmatprep.mubr.msk.f32.mxu1 %vm237_vm5, %v655_v44  ;;  %1105 = vmatprep.mubr.msk.f32.mxu0 %vm1212_vm7, %v1213_v60 }
 0x114   :  { %1157 = vmatpush3.bf16.msra.mxu0 %v1156_v61 }
 0x115   :  { %1092 = vmatmul.mubr.msk.f32.vlgmr.msra.gmra.mrb[0].mxu1 %vm237_vm5, %v657_v32 }
 0x116   :  { %1094 = vmatprep.mubr.msk.f32.mxu1 %vm237_vm5, %v659_v50 }
 0x119   :  { %1095 = vmatmul.mubr.msk.f32.gmra.mrb[2].mxu1 %vm237_vm5, %v661_v52 }
 0x1e1   :  { %v1051_v62 = vpop.f32.mrb[4].mxu0 }
 0x1e2   :  { %v405_v63 = vpop.f32.mrb[5].mxu0 }
 0x1e5   :  { %v1054_v0 = vpop.f32.mrb[6].mxu0 }
 0x1e6   :  { %v415_v1 = vpop.f32.mrb[7].mxu0 }
 0x1e8   :  { %v1093_v2 = vpop.f32.mrb[0].mxu1 }
 0x1e9   :  { %v1158_v4 = vadd.f32 %v1093_v2, %v1051_v62  ;;  %v736_v5 = vpop.f32.mrb[1].mxu1 }
 0x1ea   :  { %v1159_v6 = vadd.f32 %v736_v5, %v405_v63 }
 0x1eb   :  { %v767_v7 = vadd.f32 %v1158_v4, %v960_v3 }
 0x1ec   :  { %v766_v8 = vadd.f32 %v1159_v6, %v960_v3  ;;  %v1096_v9 = vpop.f32.mrb[2].mxu1 }
 0x1ed   :  { %v771_v10 = vmul.f32 0.2, %v767_v7  ;;  %v1160_v11 = vadd.f32 %v1096_v9, %v1054_v0  ;;  %v746_v12 = vpop.f32.mrb[3].mxu1 }
 0x1ee   :  { %v770_v14 = vmul.f32 0.2, %v766_v8  ;;  %v1161_v15 = vadd.f32 %v746_v12, %v415_v1 }
 0x1ef   :  { %v775_v17 = vmax.f32 %v767_v7, %v771_v10  ;;  %v769_v18 = vadd.f32 %v1160_v11, %v960_v3 }
 0x1f0   :  { %v774_v19 = vmax.f32 %v766_v8, %v770_v14  ;;  %v768_v20 = vadd.f32 %v1161_v15, %v960_v3 }
 0x1f1   :  { %v803_v21 = vmul.f32 %v790_v13, %v775_v17  ;;  %v773_v22 = vmul.f32 0.2, %v769_v18 }
 0x1f2   :  { %v802_v23 = vmul.f32 %v785_v16, %v774_v19  ;;  %v772_v24 = vmul.f32 0.2, %v768_v20 }
 0x1f3   :  { %v807_v25 = vsel %vm237_vm5, %v803_v21, 0.0  ;;  %v777_v26 = vmax.f32 %v769_v18, %v773_v22 }
 0x1f4   :  { %v806_v28 = vsel %vm237_vm5, %v802_v23, 0.0  ;;  %v776_v29 = vmax.f32 %v768_v20, %v772_v24 }
 0x1f5   :  { %v808_v31 = vadd.f32 %v807_v25, %v806_v28  ;;  %v805_v33 = vmul.f32 %v800_v27, %v777_v26 }
 0x1f6   :  { %v804_v34 = vmul.f32 %v795_v30, %v776_v29 }
 0x1f7   :  { %v809_v36 = vrot.slane %v808_v31, 4  ;;  %v816_v37 = vsel %vm237_vm5, %v805_v33, 0.0 }
 0x1f8   :  { %v815_v38 = vsel %vm237_vm5, %v804_v34, 0.0 }
 0x1f9   :  { %v810_v39 = vadd.f32 %v809_v36, %v808_v31  ;;  %v817_v40 = vadd.f32 %v816_v37, %v815_v38 }
 0x1fb   :  { %v811_v41 = vrot.slane %v810_v39, 2  ;;  %v818_v42 = vrot.slane %v817_v40, 4 }
 0x1fd   :  { %v812_v43 = vadd.f32 %v811_v41, %v810_v39  ;;  %v819_v44 = vadd.f32 %v818_v42, %v817_v40 }
 0x1ff   :  { %v820_v45 = vrot.slane %v819_v44, 2  ;;  %v813_v47 = vrot.slane %v812_v43, 1 }
 0x201   :  { %v821_v46 = vadd.f32 %v820_v45, %v819_v44  ;;  %v814_v49 = vadd.f32 %v813_v47, %v812_v43 }
 0x203   :  { %v822_v48 = vrot.slane %v821_v46, 1 }
 0x205   :  { %v823_v32 = vadd.f32 %v822_v48, %v821_v46 }
 0x207   :  { %v838_v50 = vsel %vm837_vm8, %v823_v32, %v814_v49 }
 0x208   :  { %1106 = vmatmul.mubr.msk.f32.vlgmr.msra.gmra.mrb[8].mxu0 %vm237_vm5, %v838_v50 }
 0x2db   :  { %v907_v51 = vpop.f32.mrb[8].mxu0 }
 0x2dc   :  { %v908_v52 = vadd.f32 %v961_v35, %v907_v51  ;;  %v1107_v53 = vpop.f32.mrb[9].mxu0 }
 0x2de   :  { %912 = vst.msk [vmem:[%s1476_s9] sm:$0x3] %vm911_vm9, %v908_v52 }
 0x2df   :  { %917 = vsyncpa [#allocation4], 1 }

</bundles_post_ra>
